<compile_context>
chip_gen: v6e
topology: v6e:2x2x1
jax: 0.10.0
libtpu: 0.0.40
codegen_flags: <defaults>
</compile_context>

<pallas_src>
import numpy as np
import jax
import jax.numpy as jnp
from jax.experimental import pallas as pl
from jax.experimental.pallas import tpu as pltpu

DIM = 20
ITERATIONS = 1
GATE_PAD = 128          # each gate's output padded to one full 128-lane chunk
MAX_TILE = 256          # row/col tile cap for the A @ H aggregation


def grnn_kernel(a_ref, hk_ref, hi_ref, wzr_ref, bzr_ref, whh_ref, bhh_ref,
                out_ref, x_acc):
    k = pl.program_id(1)

    @pl.when(k == 0)
    def _():
        x_acc[...] = jnp.zeros_like(x_acc)

    # Neighbor aggregation x[u] = sum_v A[u, v] * h[v], accumulated over k tiles.
    a = a_ref[...].astype(jnp.float32)          # bf16 (exact 0/1) -> f32
    x_acc[...] += jnp.dot(a, hk_ref[...], preferred_element_type=jnp.float32)

    @pl.when(k == pl.num_programs(1) - 1)
    def _():
        x = x_acc[...]                                             # [tm, DIM]
        h = hi_ref[...]                                            # [tm, DIM]
        # Fused z/r gate matmul: [x|h] @ [[Wz^T Wr^T];[Uz^T Ur^T]] (gate columns
        # padded to 128 lanes each so the split below is lane-tile aligned).
        xh = jnp.concatenate([x, h], axis=-1)                      # [tm, 2*DIM]
        zr = jax.nn.sigmoid(
            jnp.dot(xh, wzr_ref[...], preferred_element_type=jnp.float32)
            + bzr_ref[...])                                        # [tm, 2*GATE_PAD]
        z = zr[:, :DIM]
        r = zr[:, GATE_PAD:GATE_PAD + DIM]
        # Fused candidate matmul: [x | r*h] @ [[Wh^T];[Uh^T]].
        xrh = jnp.concatenate([x, r * h], axis=-1)                 # [tm, 2*DIM]
        h_tilde = jnp.tanh(
            jnp.dot(xrh, whh_ref[...], preferred_element_type=jnp.float32)
            + bhh_ref[...])                                        # [tm, DIM]
        out_ref[...] = z * h + (1.0 - z) * h_tilde


@jax.jit
def grnn_step(A, H, wzr, bzr, whh, bhh):
    """One GRNN update over the dense (padded) active-node representation."""
    Np = H.shape[0]
    tm = min(Np, MAX_TILE)
    tk = min(Np, MAX_TILE)
    grid = (Np // tm, Np // tk)
    return pl.pallas_call(
        grnn_kernel,
        out_shape=jax.ShapeDtypeStruct((Np, DIM), jnp.float32),
        grid_spec=pltpu.PrefetchScalarGridSpec(
            num_scalar_prefetch=0,
            grid=grid,
            in_specs=[
                pl.BlockSpec((tm, tk), lambda i, k: (i, k)),            # A tile
                pl.BlockSpec((tk, DIM), lambda i, k: (k, 0)),           # H (agg source)
                pl.BlockSpec((tm, DIM), lambda i, k: (i, 0)),           # H (own hidden)
                pl.BlockSpec((2 * DIM, 2 * GATE_PAD), lambda i, k: (0, 0)),  # Wzr slab
                pl.BlockSpec((1, 2 * GATE_PAD), lambda i, k: (0, 0)),        # bzr
                pl.BlockSpec((2 * DIM, DIM), lambda i, k: (0, 0)),           # Whh slab
                pl.BlockSpec((1, DIM), lambda i, k: (0, 0)),                 # bhh
            ],
            out_specs=pl.BlockSpec((tm, DIM), lambda i, k: (i, 0)),
            scratch_shapes=[pltpu.VMEM((tm, DIM), jnp.float32)],
        ),
        compiler_params=pltpu.CompilerParams(
            dimension_semantics=("parallel", "arbitrary"),
            vmem_limit_bytes=32 * 1024 * 1024,
        ),
    )(A, H, H, wzr, bzr, whh, bhh)


def pack_params(params):
    """Pack the six Linear layers into two weight slabs + two bias rows (once)."""
    wzr = jnp.zeros((2 * DIM, 2 * GATE_PAD), jnp.float32)
    wzr = wzr.at[:DIM, :DIM].set(params["Wz"].T)
    wzr = wzr.at[DIM:, :DIM].set(params["Uz"].T)
    wzr = wzr.at[:DIM, GATE_PAD:GATE_PAD + DIM].set(params["Wr"].T)
    wzr = wzr.at[DIM:, GATE_PAD:GATE_PAD + DIM].set(params["Ur"].T)
    bzr = jnp.zeros((1, 2 * GATE_PAD), jnp.float32)
    bzr = bzr.at[0, :DIM].set(params["bz"] + params["buz"])
    bzr = bzr.at[0, GATE_PAD:GATE_PAD + DIM].set(params["br"] + params["bur"])
    whh = jnp.concatenate([params["Wh"].T, params["Uh"].T], axis=0)   # [2*DIM, DIM]
    bhh = (params["bwh"] + params["buh"])[None, :]                    # [1, DIM]
    return wzr, bzr, whh, bhh


def _padded_size(n):
    if n <= MAX_TILE:
        return ((n + 7) // 8) * 8
    return ((n + MAX_TILE - 1) // MAX_TILE) * MAX_TILE


def grnn_forward(neighbors, node2depth, h_dict, params):
    """Mirrors GRNN.forward dict semantics; dense hot path runs in Pallas."""
    packed = pack_params(params)   # tiny, built once, reused every call
    h = {u: np.asarray(v, dtype=np.float32) for u, v in h_dict.items()}
    for i in range(ITERATIONS):
        active = sorted(u for u in h if node2depth[u] + i <= ITERATIONS)
        n = len(active)
        if n == 0:
            return {}
        idx_of = {u: k for k, u in enumerate(active)}
        Np = _padded_size(n)

        # Dense packing via edge lists (no O(N^2) python pair loop).
        rows, cols = [], []
        for u in active:
            ui = idx_of[u]
            for v in neighbors.get(u, ()):
                vi = idx_of.get(v)
                if vi is not None:
                    rows.append(ui)
                    cols.append(vi)
        A = np.zeros((Np, Np), dtype=np.float32)
        if rows:
            A[np.asarray(rows), np.asarray(cols)] = 1.0
        H = np.zeros((Np, DIM), dtype=np.float32)
        H[:n] = np.stack([h[u] for u in active], axis=0)

        # 0/1 adjacency is exact in bf16 -> halves HBM bytes of the [N,N] operand.
        H_new = jax.block_until_ready(
            grnn_step(jnp.asarray(A, dtype=jnp.bfloat16), jnp.asarray(H), *packed))
        H_new = np.asarray(H_new)
        # Padded rows (>= n) are discarded here: their update is tanh/sigmoid of
        # the bias, so keeping them would be wrong.
        h = {u: H_new[idx_of[u]] for u in active}
    return h


def init_params(key):
    """Deterministic nn.Linear-style init: U(-1/sqrt(DIM), 1/sqrt(DIM))."""
    bound = 1.0 / np.sqrt(DIM)
    names = ["Wz", "Uz", "Wr", "Ur", "Wh", "Uh"]
    bias_names = ["bz", "buz", "br", "bur", "bwh", "buh"]
    keys = jax.random.split(key, 2 * len(names))
    params = {}
    for k, (wname, bname) in enumerate(zip(names, bias_names)):
        params[wname] = jax.random.uniform(
            keys[2 * k], (DIM, DIM), jnp.float32, -bound, bound)
        params[bname] = jax.random.uniform(
            keys[2 * k + 1], (DIM,), jnp.float32, -bound, bound)
    return params


def reference_forward(neighbors, node2depth, h_dict, params):
    """Pure-numpy replica of the PyTorch dict-based forward (ground truth)."""
    p = {k: np.asarray(v) for k, v in params.items()}
    sig = lambda t: 1.0 / (1.0 + np.exp(-t))
    lin = lambda W, b, v: v @ W.T + b
    h = {k: np.asarray(v, dtype=np.float32) for k, v in h_dict.items()}
    for i in range(ITERATIONS):
        x = {u: np.zeros(DIM, np.float32) for u in h.keys()
             if node2depth[u] + i <= ITERATIONS}
        for u in x.keys():
            for v in neighbors.get(u, ()):
                if v in x:
                    x[u] = x[u] + h[v]
        h_temp = {}
        for u in x.keys():
            xi, hi = x[u], h[u]
            z = sig(lin(p["Wz"], p["bz"], xi) + lin(p["Uz"], p["buz"], hi))
            r = sig(lin(p["Wr"], p["br"], xi) + lin(p["Ur"], p["bur"], hi))
            h_temp[u] = z * hi + (1 - z) * np.tanh(
                lin(p["Wh"], p["bwh"], xi) + lin(p["Uh"], p["buh"], r * hi))
        h = h_temp
    return h


if __name__ == "__main__":
    key = jax.random.PRNGKey(0)
    pkey, hkey = jax.random.split(key)
    params = init_params(pkey)

    # Small undirected graph on 8 nodes.
    edges = [(0, 1), (0, 3), (1, 2), (2, 3), (3, 5), (5, 7), (1, 7), (4, 5), (6, 7)]
    num_nodes = 8
    neighbors = {u: set() for u in range(num_nodes)}
    for a, b in edges:
        neighbors[a].add(b)
        neighbors[b].add(a)

    # Depths: nodes with depth <= ITERATIONS are active (6 of 8 here).
    node2depth = {0: 0, 1: 1, 2: 1, 3: 0, 4: 2, 5: 1, 6: 3, 7: 0}

    # Hidden state dict for every node.
    H_all = jax.random.normal(hkey, (num_nodes, DIM), jnp.float32)
    h_dict = {u: np.asarray(H_all[u]) for u in range(num_nodes)}

    out = grnn_forward(neighbors, node2depth, h_dict, params)
    ref = reference_forward(neighbors, node2depth, h_dict, params)

    assert set(out.keys()) == set(ref.keys())
    for u in out.keys():
        np.testing.assert_allclose(out[u], ref[u], rtol=1e-5, atol=1e-5)

    print("KERNEL_OK")
</pallas_src>

<mosaic_0001>
module attributes {stable_mosaic.version = 11 : i64} {
  func.func @grnn_kernel(%arg0: i32, %arg1: i32, %arg2: memref<8x8xbf16, #tpu.memory_space<vmem>>, %arg3: memref<8x20xf32, #tpu.memory_space<vmem>>, %arg4: memref<8x20xf32, #tpu.memory_space<vmem>>, %arg5: memref<40x256xf32, #tpu.memory_space<vmem>>, %arg6: memref<1x256xf32, #tpu.memory_space<vmem>>, %arg7: memref<40x20xf32, #tpu.memory_space<vmem>>, %arg8: memref<1x20xf32, #tpu.memory_space<vmem>>, %arg9: memref<8x20xf32, #tpu.memory_space<vmem>>, %arg10: memref<8x20xf32, #tpu.memory_space<vmem>>) attributes {dimension_semantics = [#tpu.dimension_semantics<parallel>, #tpu.dimension_semantics<arbitrary>], iteration_bounds = array<i64: 1, 1>, scalar_prefetch = 0 : i64, scratch_operands = 1 : i64, tpu.core_type = #tpu.core_type<tc>, window_params = [{transform_indices = @transform_0, window_bounds = array<i64: 8, 8>}, {transform_indices = @transform_1, window_bounds = array<i64: 8, 20>}, {transform_indices = @transform_2, window_bounds = array<i64: 8, 20>}, {pipeline_mode = #tpu.pipeline_mode<synchronous>, transform_indices = @transform_3, window_bounds = array<i64: 40, 256>}, {pipeline_mode = #tpu.pipeline_mode<synchronous>, transform_indices = @transform_4, window_bounds = array<i64: 1, 256>}, {pipeline_mode = #tpu.pipeline_mode<synchronous>, transform_indices = @transform_5, window_bounds = array<i64: 40, 20>}, {pipeline_mode = #tpu.pipeline_mode<synchronous>, transform_indices = @transform_6, window_bounds = array<i64: 1, 20>}, {transform_indices = @transform_7, window_bounds = array<i64: 8, 20>}]} {
    %c0_i32 = arith.constant 0 : i32
    %0 = arith.cmpi eq, %arg1, %c0_i32 : i32
    %1 = arith.extui %0 : i1 to i32
    %c0_i32_0 = arith.constant 0 : i32
    %2 = arith.cmpi ne, %1, %c0_i32_0 : i32
    scf.if %2 {
      %cst_10 = arith.constant 0.000000e+00 : f32
      %13 = vector.broadcast %cst_10 : f32 to vector<8x20xf32>
      %c0_11 = arith.constant 0 : index
      %c0_12 = arith.constant 0 : index
      %14 = vector.load %arg10[%c0_11, %c0_12] : memref<8x20xf32, #tpu.memory_space<vmem>>, vector<8x20xf32>
      tpu.vector_store %arg10[%c0_11, %c0_12], %13 {strides = array<i32>} : memref<8x20xf32, #tpu.memory_space<vmem>>, vector<8x20xf32>,
    } else {
    }
    %c0 = arith.constant 0 : index
    %c0_1 = arith.constant 0 : index
    %3 = vector.load %arg2[%c0, %c0_1] : memref<8x8xbf16, #tpu.memory_space<vmem>>, vector<8x8xbf16>
    %4 = arith.extf %3 : vector<8x8xbf16> to vector<8x8xf32>
    %c0_2 = arith.constant 0 : index
    %c0_3 = arith.constant 0 : index
    %5 = vector.load %arg10[%c0_2, %c0_3] : memref<8x20xf32, #tpu.memory_space<vmem>>, vector<8x20xf32>
    %c0_4 = arith.constant 0 : index
    %c0_5 = arith.constant 0 : index
    %6 = vector.load %arg3[%c0_4, %c0_5] : memref<8x20xf32, #tpu.memory_space<vmem>>, vector<8x20xf32>
    %cst = arith.constant dense<0.000000e+00> : vector<8x20xf32>
    %7 = tpu.matmul %4, %6, %cst {dimension_numbers = #tpu.dot_dimension_numbers<[1], [0], [0], [1], [0, 0, 1, 1], [], []>} : vector<8x8xf32>, vector<8x20xf32>, vector<8x20xf32> -> vector<8x20xf32>
    %8 = arith.addf %5, %7 : vector<8x20xf32>
    %c0_6 = arith.constant 0 : index
    %c0_7 = arith.constant 0 : index
    %9 = vector.load %arg10[%c0_6, %c0_7] : memref<8x20xf32, #tpu.memory_space<vmem>>, vector<8x20xf32>
    tpu.vector_store %arg10[%c0_6, %c0_7], %8 {strides = array<i32>} : memref<8x20xf32, #tpu.memory_space<vmem>>, vector<8x20xf32>,
    %c0_i32_8 = arith.constant 0 : i32
    %10 = arith.cmpi eq, %arg1, %c0_i32_8 : i32
    %11 = arith.extui %10 : i1 to i32
    %c0_i32_9 = arith.constant 0 : i32
    %12 = arith.cmpi ne, %11, %c0_i32_9 : i32
    scf.if %12 {
      %c0_10 = arith.constant 0 : index
      %c0_11 = arith.constant 0 : index
      %13 = vector.load %arg10[%c0_10, %c0_11] : memref<8x20xf32, #tpu.memory_space<vmem>>, vector<8x20xf32>
      %c0_12 = arith.constant 0 : index
      %c0_13 = arith.constant 0 : index
      %14 = vector.load %arg4[%c0_12, %c0_13] : memref<8x20xf32, #tpu.memory_space<vmem>>, vector<8x20xf32>
      %15 = tpu.concatenate %13, %14 in 1 : vector<8x20xf32>, vector<8x20xf32> -> vector<8x40xf32>
      %c0_14 = arith.constant 0 : index
      %c0_15 = arith.constant 0 : index
      %16 = vector.load %arg5[%c0_14, %c0_15] : memref<40x256xf32, #tpu.memory_space<vmem>>, vector<40x256xf32>
      %cst_16 = arith.constant dense<0.000000e+00> : vector<8x256xf32>
      %17 = tpu.matmul %15, %16, %cst_16 {dimension_numbers = #tpu.dot_dimension_numbers<[1], [0], [0], [1], [0, 0, 1, 1], [], []>} : vector<8x40xf32>, vector<40x256xf32>, vector<8x256xf32> -> vector<8x256xf32>
      %c0_17 = arith.constant 0 : index
      %c0_18 = arith.constant 0 : index
      %18 = vector.load %arg6[%c0_17, %c0_18] : memref<1x256xf32, #tpu.memory_space<vmem>>, vector<1x256xf32>
      %19 = vector.broadcast %18 : vector<1x256xf32> to vector<8x256xf32>
      %20 = arith.addf %17, %19 : vector<8x256xf32>
      %21 = arith.negf %20 : vector<8x256xf32>
      %22 = math.exp %21 : vector<8x256xf32>
      %cst_19 = arith.constant 1.000000e+00 : f32
      %23 = vector.broadcast %cst_19 : f32 to vector<8x256xf32>
      %24 = arith.addf %23, %22 : vector<8x256xf32>
      %25 = arith.divf %23, %24 : vector<8x256xf32>
      %26 = vector.extract_strided_slice %25 {offsets = [0, 0], sizes = [8, 20], strides = [1, 1]} : vector<8x256xf32> to vector<8x20xf32>
      %27 = vector.extract_strided_slice %25 {offsets = [0, 128], sizes = [8, 20], strides = [1, 1]} : vector<8x256xf32> to vector<8x20xf32>
      %28 = arith.mulf %27, %14 : vector<8x20xf32>
      %29 = tpu.concatenate %13, %28 in 1 : vector<8x20xf32>, vector<8x20xf32> -> vector<8x40xf32>
      %c0_20 = arith.constant 0 : index
      %c0_21 = arith.constant 0 : index
      %30 = vector.load %arg7[%c0_20, %c0_21] : memref<40x20xf32, #tpu.memory_space<vmem>>, vector<40x20xf32>
      %cst_22 = arith.constant dense<0.000000e+00> : vector<8x20xf32>
      %31 = tpu.matmul %29, %30, %cst_22 {dimension_numbers = #tpu.dot_dimension_numbers<[1], [0], [0], [1], [0, 0, 1, 1], [], []>} : vector<8x40xf32>, vector<40x20xf32>, vector<8x20xf32> -> vector<8x20xf32>
      %c0_23 = arith.constant 0 : index
      %c0_24 = arith.constant 0 : index
      %32 = vector.load %arg8[%c0_23, %c0_24] : memref<1x20xf32, #tpu.memory_space<vmem>>, vector<1x20xf32>
      %33 = vector.broadcast %32 : vector<1x20xf32> to vector<8x20xf32>
      %34 = arith.addf %31, %33 : vector<8x20xf32>
      %35 = math.tanh %34 : vector<8x20xf32>
      %36 = arith.mulf %26, %14 : vector<8x20xf32>
      %cst_25 = arith.constant 1.000000e+00 : f32
      %37 = vector.broadcast %cst_25 : f32 to vector<8x20xf32>
      %38 = arith.subf %37, %26 : vector<8x20xf32>
      %39 = arith.mulf %38, %35 : vector<8x20xf32>
      %40 = arith.addf %36, %39 : vector<8x20xf32>
      %c0_26 = arith.constant 0 : index
      %c0_27 = arith.constant 0 : index
      %41 = vector.load %arg9[%c0_26, %c0_27] : memref<8x20xf32, #tpu.memory_space<vmem>>, vector<8x20xf32>
      tpu.vector_store %arg9[%c0_26, %c0_27], %40 {strides = array<i32>} : memref<8x20xf32, #tpu.memory_space<vmem>>, vector<8x20xf32>,
    } else {
    }
    return
  }
  func.func @transform_0(%arg0: i32, %arg1: i32) -> (i32, i32) {
    %c0_i32 = arith.constant 0 : i32
    return %arg0, %arg1 : i32, i32
  }
  func.func @transform_1(%arg0: i32, %arg1: i32) -> (i32, i32) {
    %c0_i32 = arith.constant 0 : i32
    %c0_i32_0 = arith.constant 0 : i32
    return %arg1, %c0_i32 : i32, i32
  }
  func.func @transform_2(%arg0: i32, %arg1: i32) -> (i32, i32) {
    %c0_i32 = arith.constant 0 : i32
    %c0_i32_0 = arith.constant 0 : i32
    return %arg0, %c0_i32 : i32, i32
  }
  func.func @transform_3(%arg0: i32, %arg1: i32) -> (i32, i32) {
    %c0_i32 = arith.constant 0 : i32
    %c0_i32_0 = arith.constant 0 : i32
    %c0_i32_1 = arith.constant 0 : i32
    return %c0_i32, %c0_i32_0 : i32, i32
  }
  func.func @transform_4(%arg0: i32, %arg1: i32) -> (i32, i32) {
    %c0_i32 = arith.constant 0 : i32
    %c0_i32_0 = arith.constant 0 : i32
    %c0_i32_1 = arith.constant 0 : i32
    return %c0_i32, %c0_i32_0 : i32, i32
  }
  func.func @transform_5(%arg0: i32, %arg1: i32) -> (i32, i32) {
    %c0_i32 = arith.constant 0 : i32
    %c0_i32_0 = arith.constant 0 : i32
    %c0_i32_1 = arith.constant 0 : i32
    return %c0_i32, %c0_i32_0 : i32, i32
  }
  func.func @transform_6(%arg0: i32, %arg1: i32) -> (i32, i32) {
    %c0_i32 = arith.constant 0 : i32
    %c0_i32_0 = arith.constant 0 : i32
    %c0_i32_1 = arith.constant 0 : i32
    return %c0_i32, %c0_i32_0 : i32, i32
  }
  func.func @transform_7(%arg0: i32, %arg1: i32) -> (i32, i32) {
    %c0_i32 = arith.constant 0 : i32
    %c0_i32_0 = arith.constant 0 : i32
    return %arg0, %c0_i32 : i32, i32
  }
}

</mosaic_0001>

<bundles_post_ra>
// kernel: grnn_step.1
= control target key start
LH: loop header
LB: loop body
LE: loop exit
PB: predicated region body
PF: predicated region fallthrough
CT: control target
= control target key end

     0   :  { %12 = vsyncpa [#allocation4], 0  ;;  %s549_s0 = inlined_call_operand.vmem [shape: bf16[8,8], index: 0, kind: input, shape index: {}]   ;;  %s550_s1 = inlined_call_operand.vmem [shape: f32[8,20], index: 1, kind: input, shape index: {}, may-alias: {1,2}]   ;;  %s551_s2 = inlined_call_operand.vmem [shape: f32[8,20], index: 2, kind: input, shape index: {}, may-alias: {1,2}]   ;;  %s552_s3 = inlined_call_operand.hbm [shape: f32[40,256], index: 3, kind: input, shape index: {}]   ;;  %s553_s4 = inlined_call_operand.vmem [shape: f32[1,256], index: 4, kind: input, shape index: {}]   ;;  %s554_s5 = inlined_call_operand.vmem [shape: f32[40,20], index: 5, kind: input, shape index: {}]   ;;  %s555_s6 = inlined_call_operand.vmem [shape: f32[1,20], index: 6, kind: input, shape index: {}]   ;;  %s556_s7 = inlined_call_operand.hbm [shape: f32[8,20], index: 7, kind: output, shape index: {}]  }
   0x1   :  { %13 = vsyncpa [#allocation5], 0  ;;  %s452_s24 = smov [#allocation3]  }
   0x2   :  { %s25_s25 = sshll.u32 %s452_s24, 4  ;;  %s26_s25 = int_to_ptr.vmem [resolvable:$true] %s25_s25 }
   0x3   :  { %s416_s26 = scalar_lea.vmem %s26_s25, 1280  ;;  %p421_p1 = scmp.lt.s32.totalorder %s26_s25, %s26_s25 }
   0x4   :  { %p417_p0 = scmp.ne.s32.totalorder %s26_s25, %s416_s26  ;;  %p422_p2 = scmp.lt.s32.totalorder %s416_s26, %s416_s26 }
   0x6   :  { %p423_p3 = por %p422_p2, %p421_p1 }
   0x8   :  { %p424_p4 = pnand %p423_p3, %p417_p0 }
   0xa   :  { %427 = shalt.err (!%p424_p4)
}
   0xb   :  { %s453_s27 = smov 256   ;;  %s454_s28 = smov 16  }
   0xc   :  { %31 = dma.hbm_to_vmem [thread:$0]  %s552_s3, 1280, %s26_s25, [#allocation4], %s453_s27, %s453_s27, %s454_s28  }
   0xd   :  { %448 = dma.done.wait [#allocation4], 1280  }
   0xe   :  { %449 = vsyncadd [#allocation4], 4294966016  ;;  %v455_v0 = vmov 0.0   ;;  %vm456_vm0 = vmmov 0   ;;  %vm45_vm1 = vcmask 162816   ;;  %v50_v1 = vld [vmem:[%s550_s1] sm:$0xff]  ;;  %v150_v26 = vlaneseq }
   0xf   :  { %373 = vmatprep.subr.mxu0 %v455_v0  ;;  %375 = vmatprep.mubr.msk.f32.mxu0 %vm456_vm0, %v455_v0  ;;  %46 = vst.msk [vmem:[#allocation2] sm:$0xff] %vm45_vm1, %v455_v0  ;;  %v47_v2 = vld [vmem:[%s549_s0] sm:$0xf]  ;;  %vm51_vm2 = vcmask 64512   ;;  %s457_s13 = smov 20   ;;  %v147_v5 = vld [vmem:[#allocation3 + $0x48] sm:$0xff] }
  0x10   :  { %228 = vmatprep.mubr.f32.mxu1 %v455_v0  ;;  %v512_v3 = vld [vmem:[%s551_s2] sm:$0xff]  ;;  %374 = vmatpush3.msra.mxu0 %v50_v1  ;;  %v48_v4 = vunpack.c.l.bf16 %v47_v2  ;;  %v146_v6 = vld [vmem:[#allocation3 + $0x40] sm:$0xff]  ;;  %v144_v8 = vld [vmem:[#allocation3 + $0x30] sm:$0xff]  ;;  %vm160_vm3 = vcmask 326656   ;;  %v151_v27 = vshrl.u32 %v150_v26, 7  ;;  %s458_s23 = smov [#allocation6]  }
  0x11   :  { %134 = vrot.lane.b32.xlu0 %v512_v3, %s457_s13  ;;  %378 = vmatprep.subr.mxu0 %v455_v0  ;;  %v145_v7 = vld [vmem:[#allocation3 + $0x38] sm:$0xff]  ;;  %v143_v9 = vld [vmem:[#allocation3 + $0x28] sm:$0xff]  ;;  %v142_v10 = vld [vmem:[#allocation3 + $0x20] sm:$0xff]  ;;  %s350_s24 = sshll.u32 %s458_s23, 4  ;;  %s351_s24 = int_to_ptr.vmem [resolvable:$true] %s350_s24 }
  0x12   :  { %376 = vmatmul.mubr.msk.f32.vlgmr.msra.gmra.mxu0 %vm51_vm2, %v48_v4  ;;  %186 = vmatprep.subr.mxu1 %v147_v5  ;;  %v141_v11 = vld [vmem:[#allocation3 + $0x18] sm:$0xff]  ;;  %v140_v12 = vld [vmem:[#allocation3 + $0x10] sm:$0xff]  ;;  %v139_v13 = vld [vmem:[#allocation3 + $0x8] sm:$0xff]  ;;  %v156_v28 = vsub.s32 1, %v151_v27  ;;  %v152_v42 = vsub.s32 0, %v151_v27  ;;  %s428_s25 = scalar_lea.vmem %s351_s24, 128  ;;  %p433_p6 = scmp.lt.s32.totalorder %s351_s24, %s351_s24 }
  0x13   :  { %388 = vmatprep.mubr.msk.f32.mxu0 %vm456_vm0, %v455_v0  ;;  %187 = vmatpush1.msra.mxu1 %v146_v6  ;;  %v138_v14 = vld [vmem:[#allocation3] sm:$0xff]  ;;  %v257_v22 = vld [vmem:[%s554_s5 + $0x20] sm:$0xff]  ;;  %v256_v23 = vld [vmem:[%s554_s5 + $0x18] sm:$0xff]  ;;  %p429_p5 = scmp.ne.s32.totalorder %s351_s24, %s428_s25  ;;  %p434_p7 = scmp.lt.s32.totalorder %s428_s25, %s428_s25 }
  0x14   :  { %188 = vmatprep.subr.mxu1 %v145_v7  ;;  %379 = vmatpush3.msra.mxu0 %v257_v22  ;;  %v255_v24 = vld [vmem:[%s554_s5 + $0x10] sm:$0xff]  ;;  %v254_v25 = vld [vmem:[%s554_s5 + $0x8] sm:$0xff]  ;;  %v148_v29 = vld [vmem:[%s553_s4] sm:$0x3] }
  0x15   :  { %189 = vmatpush1.msra.mxu1 %v144_v8  ;;  %380 = vmatprep.subr.mxu0 %v455_v0  ;;  %v157_v30 = vrot.slane %v148_v29, %v156_v28  ;;  %v253_v37 = vld [vmem:[%s554_s5] sm:$0xff]  ;;  %v153_v43 = vrot.slane %v148_v29, %v152_v42  ;;  %p435_p8 = por %p434_p7, %p433_p6 }
  0x16   :  { %190 = vmatprep.subr.mxu1 %v143_v9  ;;  %v49_v15 = vld [vmem:[#allocation2] sm:$0xff]  ;;  %381 = vmatpush3.msra.mxu0 %v256_v23 }
  0x17   :  { %191 = vmatpush1.msra.mxu1 %v142_v10  ;;  %382 = vmatprep.subr.mxu0 %v455_v0  ;;  %v363_v48 = vld [vmem:[%s555_s6] ss:$0 sm:$0xff]  ;;  %p436_p9 = pnand %p435_p8, %p429_p5 }
  0x18   :  { %192 = vmatprep.subr.mxu1 %v141_v11  ;;  %383 = vmatpush3.msra.mxu0 %v255_v24 }
  0x19   :  { %193 = vmatpush1.msra.mxu1 %v140_v12  ;;  %384 = vmatprep.subr.mxu0 %v455_v0 }
  0x1a   :  { %194 = vmatprep.subr.mxu1 %v139_v13  ;;  %385 = vmatpush3.msra.mxu0 %v254_v25 }
  0x1b   :  { %195 = vmatpush1.msra.mxu1 %v138_v14  ;;  %386 = vmatprep.subr.mxu0 %v455_v0 }
  0x1c   :  { %387 = vmatpush3.msra.mxu0 %v253_v37 }
  0x83   :  { %v135_v19 = vpop.permute.xlu0 %134 }
  0xd2   :  { %v121_v16 = vpop.f32.mrf.mxu0 }
  0xd3   :  { %v125_v17 = vadd.f32 %v121_v16, %v49_v15 }
  0xd4   :  { %v377_v18 = vpop.f32.mrf.mxu0 }
  0xd5   :  { %127 = vst.msk [vmem:[#allocation2] sm:$0xff] %vm45_vm1, %v125_v17 }
  0xdc   :  { %v131_v20 = vld [vmem:[#allocation2] sm:$0xff] }
  0xdd   :  { %v137_v21 = vsel %vm45_vm1, %v131_v20, %v135_v19 }
  0xde   :  { %360 = vmatmul.mubr.msk.f32.vlgmr.msra.gmra.mxu1 %vm160_vm3, %v137_v21 }
 0x19e   :  { %v230_v31 = vpop.f32.mrf.mxu1 }
 0x19f   :  { %v231_v44 = vadd.f32 %v230_v31, %v153_v43 }
 0x1a0   :  { %v232_v32 = vpop.f32.mrf.mxu1 }
 0x1a1   :  { %v233_v33 = vadd.f32 %v232_v32, %v157_v30  ;;  %v361_v45 = vmul.f32 -1.442695, %v231_v44 }
 0x1a3   :  { %v362_v34 = vmul.f32 -1.442695, %v233_v33 }
 0x1a5   :  { %398 = vpow2.f32 %v362_v34 }
 0x1b2   :  { %v399_v35 = vpop.eup %398 }
 0x1b3   :  { %v242_v36 = vadd.f32 1.0, %v399_v35 }
 0x1b5   :  { %400 = vrcp.f32 %v242_v36 }
 0x1b6   :  { %402 = vpow2.f32 %v361_v45 }
 0x1c2   :  { %v401_v38 = vpop.eup %400 }
 0x1c3   :  { %v247_v39 = vmul.f32 %v401_v38, %v512_v3  ;;  %v403_v46 = vpop.eup %402 }
 0x1c4   :  { %v241_v47 = vadd.f32 1.0, %v403_v46 }
 0x1c5   :  { %249 = vrot.lane.b32.xlu0 %v247_v39, %s457_s13 }
 0x1c6   :  { %404 = vrcp.f32 %v241_v47 }
 0x1d3   :  { %v405_v52 = vpop.eup %404 }
 0x1d4   :  { %v340_v53 = vsub.f32 1.0, %v405_v52  ;;  %v339_v55 = vmul.f32 %v405_v52, %v512_v3 }
 0x237   :  { %v250_v40 = vpop.permute.xlu0 %249 }
 0x238   :  { %v252_v41 = vsel %vm45_vm1, %v131_v20, %v250_v40 }
 0x239   :  { %389 = vmatmul.mubr.msk.f32.vlgmr.msra.gmra.mxu0 %vm160_vm3, %v252_v41 }
 0x2f9   :  { %v334_v49 = vpop.f32.mrf.mxu0 }
 0x2fa   :  { %v335_v50 = vadd.f32 %v363_v48, %v334_v49 }
 0x2fb   :  { %v390_v51 = vpop.f32.mrf.mxu0 }
 0x2fc   :  { %406 = vtanh.f32 %v335_v50 }
 0x309   :  { %v407_v54 = vpop.eup %406 }
 0x30a   :  { %v341_v56 = vmul.f32 %v407_v54, %v340_v53 }
 0x30c   :  { %v342_v57 = vadd.f32 %v341_v56, %v339_v55 }
 0x30e   :  { %343 = vst.msk [vmem:[#allocation6] sm:$0xff] %vm45_vm1, %v342_v57 }
 0x30f   :  { %439 = shalt.err (!%p436_p9)
}
 0x310   :  { %353 = dma.vmem_to_hbm [thread:$0]  %s351_s24, 128, %s556_s7, [#allocation5]  }
 0x311   :  { %450 = dma.done.wait [#allocation5], 128  }
 0x312   :  { %451 = vsyncadd [#allocation5], 4294967168 }
 0x313   :  { %357 = vsyncpa [#allocation4], 1 }
 0x314   :  { %358 = vsyncpa [#allocation5], 1 }

</bundles_post_ra>
